<compile_context>
chip_gen: v7x
topology: tpu7x:2x2x1
jax: 0.10.0
libtpu: 0.0.40
codegen_flags: <defaults>
</compile_context>

<pallas_src>
import functools

import jax
import jax.numpy as jnp
from jax.experimental import pallas as pl
from jax.experimental.pallas import tpu as pltpu


def _round_up(x, m):
    return (x + m - 1) // m * m


def mlp_kernel(x_ref, w1_ref, b1_ref, w2_ref, b2_ref, o_ref, *, pack, d_in):
    """Fused Linear -> ReLU -> (Dropout=id) -> Linear -> ReLU -> (Dropout=id).

    `pack` batch rows are packed along the lane axis:
        x_ref[r, p*d_in:(p+1)*d_in] == x[pack*r + p, :]
    and o_ref is packed the same way, so every HBM store is a full-width
    (lane-dense) store instead of a masked 64-wide one.
    """
    x = x_ref[...]
    w1 = w1_ref[...]
    b1 = b1_ref[...]          # (1, D1) float32
    w2 = w2_ref[...]
    b2 = b2_ref[...]          # (1, D2) float32

    outs = []
    for p in range(pack):     # static Python loop (pack is a compile-time int)
        xp = x[:, p * d_in:(p + 1) * d_in]                 # 128-aligned lane slice
        h = jnp.dot(xp, w1, preferred_element_type=jnp.float32) + b1
        h = jnp.maximum(h, 0.0).astype(w1.dtype)           # back to compute dtype for MXU
        o = jnp.dot(h, w2, preferred_element_type=jnp.float32) + b2
        o = jnp.maximum(o, 0.0)
        outs.append(o)
    o_packed = outs[0] if pack == 1 else jnp.concatenate(outs, axis=-1)
    o_ref[...] = o_packed.astype(o_ref.dtype)


def mlp_forward(x, w1, b1, w2, b2, *, batch_tile=1024, compute_dtype=jnp.bfloat16):
    """Eval-mode forward of MLP([D0, D1, D2], ReLU, dropout)."""
    B, D0 = x.shape
    D1 = w1.shape[1]
    D2 = w2.shape[1]
    assert w1.shape == (D0, D1) and w2.shape == (D1, D2)
    out_dtype = x.dtype

    # Lane-dense output packing factor (D2=64 -> pack 2 rows per 128-lane row).
    pack = 128 // D2 if (D2 < 128 and 128 % D2 == 0) else 1

    # Choose an effective batch tile: aligned to sublanes after packing, never
    # larger than the (padded) batch so tiny test batches don't over-pad.
    row_align = 8 * pack
    tm = max(row_align, min(batch_tile, _round_up(B, row_align)))
    tm = _round_up(tm, row_align)
    B_pad = _round_up(B, tm)

    xc = x.astype(compute_dtype)
    if B_pad != B:
        xc = jnp.pad(xc, ((0, B_pad - B), (0, 0)))
    # Pure row-major view: row r of x_packed = [x[pack*r], ..., x[pack*r+pack-1]].
    x_packed = xc.reshape(B_pad // pack, D0 * pack)

    w1c = w1.astype(compute_dtype)
    w2c = w2.astype(compute_dtype)
    b1r = b1.reshape(1, D1).astype(jnp.float32)
    b2r = b2.reshape(1, D2).astype(jnp.float32)

    grid = (B_pad // tm,)

    in_isz = jnp.dtype(compute_dtype).itemsize
    out_isz = jnp.dtype(out_dtype).itemsize
    cost = pl.CostEstimate(
        flops=2 * B_pad * (D0 * D1 + D1 * D2),
        transcendentals=0,
        bytes_accessed=(B_pad * D0 * in_isz            # streamed x
                        + B_pad * D2 * out_isz          # streamed output
                        + (D0 * D1 + D1 * D2) * in_isz  # resident weights
                        + (D1 + D2) * 4),               # biases
    )

    kernel = functools.partial(mlp_kernel, pack=pack, d_in=D0)

    out_packed = pl.pallas_call(
        kernel,
        out_shape=jax.ShapeDtypeStruct((B_pad // pack, D2 * pack), out_dtype),
        grid_spec=pltpu.PrefetchScalarGridSpec(
            num_scalar_prefetch=0,
            grid=grid,
            in_specs=[
                pl.BlockSpec((tm // pack, D0 * pack), lambda i: (i, 0)),  # x tile
                # Constant index_maps: weights/biases are DMA'd once and stay
                # resident in VMEM across all grid steps.
                pl.BlockSpec((D0, D1), lambda i: (0, 0)),                 # W1
                pl.BlockSpec((1, D1), lambda i: (0, 0)),                  # b1
                pl.BlockSpec((D1, D2), lambda i: (0, 0)),                 # W2
                pl.BlockSpec((1, D2), lambda i: (0, 0)),                  # b2
            ],
            out_specs=pl.BlockSpec((tm // pack, D2 * pack), lambda i: (i, 0)),
        ),
        compiler_params=pltpu.CompilerParams(
            # Batch axis is embarrassingly parallel -> megacore sharding on v7x.
            dimension_semantics=("parallel",),
        ),
        cost_estimate=cost,
    )(x_packed, w1c, b1r, w2c, b2r)

    # Free row-major view back to [B, D2], dropping batch padding.
    return out_packed.reshape(B_pad, D2)[:B]


def reference_forward(x, w1, b1, w2, b2):
    h = jnp.maximum(x @ w1 + b1, 0.0)
    return jnp.maximum(h @ w2 + b2, 0.0)


if __name__ == "__main__":
    # dimensions = [256, 128, 64]  (module defaults)
    D0, D1, D2 = 256, 128, 64

    key = jax.random.PRNGKey(0)
    kx, kw1, kb1, kw2, kb2 = jax.random.split(key, 5)

    lim1 = 1.0 / (D0 ** 0.5)
    lim2 = 1.0 / (D1 ** 0.5)
    w1 = jax.random.uniform(kw1, (D0, D1), minval=-lim1, maxval=lim1, dtype=jnp.float32)
    b1 = jax.random.uniform(kb1, (D1,), minval=-lim1, maxval=lim1, dtype=jnp.float32)
    w2 = jax.random.uniform(kw2, (D1, D2), minval=-lim2, maxval=lim2, dtype=jnp.float32)
    b2 = jax.random.uniform(kb2, (D2,), minval=-lim2, maxval=lim2, dtype=jnp.float32)

    # Check 1: f32 compute path with a batch that is NOT a multiple of the
    # packing alignment (exercises the pad-and-slice path).
    B1 = 20
    x1 = jax.random.normal(kx, (B1, D0), dtype=jnp.float32)
    out1 = jax.block_until_ready(
        mlp_forward(x1, w1, b1, w2, b2, compute_dtype=jnp.float32))
    ref1 = reference_forward(x1, w1, b1.reshape(1, D1), w2, b2.reshape(1, D2))
    assert out1.shape == (B1, D2)
    assert jnp.allclose(out1, ref1, atol=1e-3, rtol=1e-3), "f32 path mismatch vs reference"

    # Check 2: default bf16 compute path (halved HBM traffic, bf16 MXU rate);
    # tolerance loosened accordingly.
    B2 = 32
    x2 = jax.random.normal(jax.random.fold_in(kx, 1), (B2, D0), dtype=jnp.float32)
    out2 = jax.block_until_ready(mlp_forward(x2, w1, b1, w2, b2))
    ref2 = reference_forward(x2, w1, b1.reshape(1, D1), w2, b2.reshape(1, D2))
    assert out2.shape == (B2, D2)
    assert jnp.allclose(out2, ref2, atol=3e-2, rtol=3e-2), "bf16 path mismatch vs reference"

    print("KERNEL_OK")
</pallas_src>

<mosaic_0001>
module attributes {stable_mosaic.version = 11 : i64} {
  func.func @mlp_kernel(%arg0: i32, %arg1: memref<16x512xf32, #tpu.memory_space<vmem>>, %arg2: memref<256x128xf32, #tpu.memory_space<vmem>>, %arg3: memref<1x128xf32, #tpu.memory_space<vmem>>, %arg4: memref<128x64xf32, #tpu.memory_space<vmem>>, %arg5: memref<1x64xf32, #tpu.memory_space<vmem>>, %arg6: memref<16x128xf32, #tpu.memory_space<vmem>>) attributes {dimension_semantics = [#tpu.dimension_semantics<parallel>], iteration_bounds = array<i64: 1>, scalar_prefetch = 0 : i64, scratch_operands = 0 : i64, tpu.core_type = #tpu.core_type<tc>, window_params = [{transform_indices = @transform_0, window_bounds = array<i64: 16, 512>}, {pipeline_mode = #tpu.pipeline_mode<synchronous>, transform_indices = @transform_1, window_bounds = array<i64: 256, 128>}, {pipeline_mode = #tpu.pipeline_mode<synchronous>, transform_indices = @transform_2, window_bounds = array<i64: 1, 128>}, {pipeline_mode = #tpu.pipeline_mode<synchronous>, transform_indices = @transform_3, window_bounds = array<i64: 128, 64>}, {pipeline_mode = #tpu.pipeline_mode<synchronous>, transform_indices = @transform_4, window_bounds = array<i64: 1, 64>}, {transform_indices = @transform_5, window_bounds = array<i64: 16, 128>}]} {
    %c0 = arith.constant 0 : index
    %c0_0 = arith.constant 0 : index
    %0 = vector.load %arg1[%c0, %c0_0] : memref<16x512xf32, #tpu.memory_space<vmem>>, vector<16x512xf32>
    %c0_1 = arith.constant 0 : index
    %c0_2 = arith.constant 0 : index
    %1 = vector.load %arg2[%c0_1, %c0_2] : memref<256x128xf32, #tpu.memory_space<vmem>>, vector<256x128xf32>
    %c0_3 = arith.constant 0 : index
    %c0_4 = arith.constant 0 : index
    %2 = vector.load %arg3[%c0_3, %c0_4] : memref<1x128xf32, #tpu.memory_space<vmem>>, vector<1x128xf32>
    %c0_5 = arith.constant 0 : index
    %c0_6 = arith.constant 0 : index
    %3 = vector.load %arg4[%c0_5, %c0_6] : memref<128x64xf32, #tpu.memory_space<vmem>>, vector<128x64xf32>
    %c0_7 = arith.constant 0 : index
    %c0_8 = arith.constant 0 : index
    %4 = vector.load %arg5[%c0_7, %c0_8] : memref<1x64xf32, #tpu.memory_space<vmem>>, vector<1x64xf32>
    %5 = vector.extract_strided_slice %0 {offsets = [0, 0], sizes = [16, 256], strides = [1, 1]} : vector<16x512xf32> to vector<16x256xf32>
    %cst = arith.constant dense<0.000000e+00> : vector<16x128xf32>
    %6 = tpu.matmul %5, %1, %cst {dimension_numbers = #tpu.dot_dimension_numbers<[1], [0], [0], [1], [0, 0, 1, 1], [], []>} : vector<16x256xf32>, vector<256x128xf32>, vector<16x128xf32> -> vector<16x128xf32>
    %7 = vector.broadcast %2 : vector<1x128xf32> to vector<16x128xf32>
    %8 = arith.addf %6, %7 : vector<16x128xf32>
    %cst_9 = arith.constant 0.000000e+00 : f32
    %9 = vector.broadcast %cst_9 : f32 to vector<16x128xf32>
    %10 = arith.maximumf %8, %9 : vector<16x128xf32>
    %cst_10 = arith.constant dense<0.000000e+00> : vector<16x64xf32>
    %11 = tpu.matmul %10, %3, %cst_10 {dimension_numbers = #tpu.dot_dimension_numbers<[1], [0], [0], [1], [0, 0, 1, 1], [], []>} : vector<16x128xf32>, vector<128x64xf32>, vector<16x64xf32> -> vector<16x64xf32>
    %12 = vector.broadcast %4 : vector<1x64xf32> to vector<16x64xf32>
    %13 = arith.addf %11, %12 : vector<16x64xf32>
    %cst_11 = arith.constant 0.000000e+00 : f32
    %14 = vector.broadcast %cst_11 : f32 to vector<16x64xf32>
    %15 = arith.maximumf %13, %14 : vector<16x64xf32>
    %16 = vector.extract_strided_slice %0 {offsets = [0, 256], sizes = [16, 256], strides = [1, 1]} : vector<16x512xf32> to vector<16x256xf32>
    %cst_12 = arith.constant dense<0.000000e+00> : vector<16x128xf32>
    %17 = tpu.matmul %16, %1, %cst_12 {dimension_numbers = #tpu.dot_dimension_numbers<[1], [0], [0], [1], [0, 0, 1, 1], [], []>} : vector<16x256xf32>, vector<256x128xf32>, vector<16x128xf32> -> vector<16x128xf32>
    %18 = vector.broadcast %2 : vector<1x128xf32> to vector<16x128xf32>
    %19 = arith.addf %17, %18 : vector<16x128xf32>
    %cst_13 = arith.constant 0.000000e+00 : f32
    %20 = vector.broadcast %cst_13 : f32 to vector<16x128xf32>
    %21 = arith.maximumf %19, %20 : vector<16x128xf32>
    %cst_14 = arith.constant dense<0.000000e+00> : vector<16x64xf32>
    %22 = tpu.matmul %21, %3, %cst_14 {dimension_numbers = #tpu.dot_dimension_numbers<[1], [0], [0], [1], [0, 0, 1, 1], [], []>} : vector<16x128xf32>, vector<128x64xf32>, vector<16x64xf32> -> vector<16x64xf32>
    %23 = vector.broadcast %4 : vector<1x64xf32> to vector<16x64xf32>
    %24 = arith.addf %22, %23 : vector<16x64xf32>
    %cst_15 = arith.constant 0.000000e+00 : f32
    %25 = vector.broadcast %cst_15 : f32 to vector<16x64xf32>
    %26 = arith.maximumf %24, %25 : vector<16x64xf32>
    %27 = tpu.concatenate %15, %26 in 1 : vector<16x64xf32>, vector<16x64xf32> -> vector<16x128xf32>
    %c0_16 = arith.constant 0 : index
    %c0_17 = arith.constant 0 : index
    %28 = vector.load %arg6[%c0_16, %c0_17] : memref<16x128xf32, #tpu.memory_space<vmem>>, vector<16x128xf32>
    tpu.vector_store %arg6[%c0_16, %c0_17], %27 {strides = array<i32>} : memref<16x128xf32, #tpu.memory_space<vmem>>, vector<16x128xf32>,
    return
  }
  func.func @transform_0(%arg0: i32) -> (i32, i32) {
    %c0_i32 = arith.constant 0 : i32
    %c0_i32_0 = arith.constant 0 : i32
    return %arg0, %c0_i32 : i32, i32
  }
  func.func @transform_1(%arg0: i32) -> (i32, i32) {
    %c0_i32 = arith.constant 0 : i32
    %c0_i32_0 = arith.constant 0 : i32
    %c0_i32_1 = arith.constant 0 : i32
    return %c0_i32, %c0_i32_0 : i32, i32
  }
  func.func @transform_2(%arg0: i32) -> (i32, i32) {
    %c0_i32 = arith.constant 0 : i32
    %c0_i32_0 = arith.constant 0 : i32
    %c0_i32_1 = arith.constant 0 : i32
    return %c0_i32, %c0_i32_0 : i32, i32
  }
  func.func @transform_3(%arg0: i32) -> (i32, i32) {
    %c0_i32 = arith.constant 0 : i32
    %c0_i32_0 = arith.constant 0 : i32
    %c0_i32_1 = arith.constant 0 : i32
    return %c0_i32, %c0_i32_0 : i32, i32
  }
  func.func @transform_4(%arg0: i32) -> (i32, i32) {
    %c0_i32 = arith.constant 0 : i32
    %c0_i32_0 = arith.constant 0 : i32
    %c0_i32_1 = arith.constant 0 : i32
    return %c0_i32, %c0_i32_0 : i32, i32
  }
  func.func @transform_5(%arg0: i32) -> (i32, i32) {
    %c0_i32 = arith.constant 0 : i32
    %c0_i32_0 = arith.constant 0 : i32
    return %arg0, %c0_i32 : i32, i32
  }
}

</mosaic_0001>

<bundles_post_ra>
// kernel: tpu_custom_call.1
= control target key start
LH: loop header
LB: loop body
LE: loop exit
PB: predicated region body
PF: predicated region fallthrough
CT: control target
= control target key end

     0   :  { %10 = vsyncpa [#allocation3], 0  ;;  %s1017_s0 = inlined_call_operand.vmem [shape: f32[16,512], index: 0, kind: input, shape index: {}]   ;;  %s1018_s1 = inlined_call_operand.hbm [shape: f32[256,128], index: 1, kind: input, shape index: {}]   ;;  %s1019_s2 = inlined_call_operand.vmem [shape: f32[1,128], index: 2, kind: input, shape index: {}]   ;;  %s1020_s3 = inlined_call_operand.vmem [shape: f32[128,64], index: 3, kind: input, shape index: {}]   ;;  %s1021_s4 = inlined_call_operand.vmem [shape: f32[1,64], index: 4, kind: input, shape index: {}]   ;;  %s1022_s5 = inlined_call_operand.hbm [shape: f32[16,128], index: 5, kind: output, shape index: {}]  }
   0x1   :  { %11 = vsyncpa [#allocation4], 0  ;;  %s808_s18 = smov [#allocation2]   ;;  %s760_s22 = scalar_lea.hbm %s1018_s1, 4096 }
   0x2   :  { %s19_s19 = sshll.u32 %s808_s18, 4  ;;  %p761_p0 = scmp.ne.s32.totalorder %s1018_s1, %s760_s22  ;;  %s20_s19 = int_to_ptr.vmem [resolvable:$true] %s19_s19 }
   0x3   :  { %p764_p1 = scmp.lt.u32.totalorder %s760_s22, %s1018_s1 }
   0x5   :  { %p766_p2 = pnand %p764_p1, %p761_p0 }
   0x7   :  { %769 = shalt.err (!%p766_p2)
}
   0x8   :  { %s770_s27 = scalar_lea.vmem %s20_s19, 4096  ;;  %p775_p4 = scmp.lt.s32.totalorder %s20_s19, %s20_s19 }
   0x9   :  { %p771_p3 = scmp.ne.s32.totalorder %s20_s19, %s770_s27  ;;  %p776_p5 = scmp.lt.s32.totalorder %s770_s27, %s770_s27 }
   0xb   :  { %p777_p6 = por %p776_p5, %p775_p4 }
   0xd   :  { %p778_p7 = pnand %p777_p6, %p771_p3 }
   0xf   :  { %781 = shalt.err (!%p778_p7)
}
  0x10   :  { %s809_s28 = smov 128   ;;  %s810_s29 = smov 8  }
  0x11   :  { %25 = dma.hbm_to_vmem [thread:$0]  %s1018_s1, 4096, %s20_s19, [#allocation3], %s809_s28, %s809_s28, %s810_s29  }
  0x12   :  { %804 = dma.done.wait [#allocation3], 4096  }
  0x13   :  { %805 = vsyncadd [#allocation3], 4294963200  ;;  %v59_v0 = vld [vmem:[#allocation2 + $0x80] sm:$0xff]  ;;  %v60_v1 = vld [vmem:[#allocation2 + $0x88] sm:$0xff]  ;;  %s811_s7 = smov 64   ;;  %vm421_vm0 = vcmask 523264  }
  0x14   :  { %v43_v2 = vld [vmem:[#allocation2] sm:$0xff]  ;;  %v858_v3 = vpack.c.bf16 %v60_v1, %v59_v0  ;;  %v44_v4 = vld [vmem:[#allocation2 + $0x8] sm:$0xff]  ;;  %v61_v5 = vld [vmem:[#allocation2 + $0x90] sm:$0xff]  ;;  %s812_s8 = smov [#allocation5]  }
  0x15   :  { %v62_v6 = vld [vmem:[#allocation2 + $0x98] sm:$0xff]  ;;  %v860_v7 = vpack.c.bf16 %v44_v4, %v43_v2  ;;  %v45_v9 = vld [vmem:[#allocation2 + $0x10] sm:$0xff]  ;;  %v63_v11 = vld [vmem:[#allocation2 + $0xa0] sm:$0xff]  ;;  %s431_s9 = sshll.u32 %s812_s8, 4  ;;  %s432_s9 = int_to_ptr.vmem [resolvable:$true] %s431_s9 }
  0x16   :  { %v862_v8 = vpack.c.bf16 %v62_v6, %v61_v5  ;;  %v46_v10 = vld [vmem:[#allocation2 + $0x18] sm:$0xff]  ;;  %628 = vmatprep.subr.bf16.mxu0 %v858_v3  ;;  %v64_v12 = vld [vmem:[#allocation2 + $0xa8] sm:$0xff]  ;;  %v47_v15 = vld [vmem:[#allocation2 + $0x20] sm:$0xff]  ;;  %p787_p9 = scmp.lt.s32.totalorder %s432_s9, %s432_s9 }
  0x17   :  { %630 = vmatpush3.bf16.msra.mxu0 %v860_v7  ;;  %v866_v13 = vpack.c.bf16 %v46_v10, %v45_v9  ;;  %v869_v14 = vpack.c.bf16 %v64_v12, %v63_v11  ;;  %v48_v16 = vld [vmem:[#allocation2 + $0x28] sm:$0xff]  ;;  %v65_v17 = vld [vmem:[#allocation2 + $0xb0] sm:$0xff]  ;;  %v66_v18 = vld [vmem:[#allocation2 + $0xb8] sm:$0xff] }
  0x18   :  { %632 = vmatprep.subr.bf16.mxu0 %v862_v8  ;;  %v872_v19 = vpack.c.bf16 %v48_v16, %v47_v15  ;;  %v875_v20 = vpack.c.bf16 %v66_v18, %v65_v17  ;;  %v49_v21 = vld [vmem:[#allocation2 + $0x30] sm:$0xff]  ;;  %v50_v22 = vld [vmem:[#allocation2 + $0x38] sm:$0xff]  ;;  %v67_v23 = vld [vmem:[#allocation2 + $0xc0] sm:$0xff] }
  0x19   :  { %v68_v24 = vld [vmem:[#allocation2 + $0xc8] sm:$0xff]  ;;  %v881_v26 = vpack.c.bf16 %v50_v22, %v49_v21  ;;  %v51_v27 = vld [vmem:[#allocation2 + $0x40] sm:$0xff]  ;;  %v69_v30 = vld [vmem:[#allocation2 + $0xd0] sm:$0xff] }
  0x1a   :  { %v36_v25 = vld [vmem:[%s1017_s0 + $0x8] sm:$0xff]  ;;  %v884_v29 = vpack.c.bf16 %v68_v24, %v67_v23  ;;  %v76_v31 = vld [vmem:[%s1020_s3] sm:$0xff]  ;;  %v70_v33 = vld [vmem:[#allocation2 + $0xd8] sm:$0xff] }
  0x1b   :  { %634 = vmatpush3.bf16.msra.mxu0 %v866_v13  ;;  %163 = vmatprep.mubr.f32.mxu0 %v36_v25  ;;  %v52_v28 = vld [vmem:[#allocation2 + $0x48] sm:$0xff]  ;;  %v78_v35 = vld [vmem:[%s1020_s3 + $0x10] sm:$0xff]  ;;  %v79_v36 = vld [vmem:[%s1020_s3 + $0x18] sm:$0xff]  ;;  %v647_v41 = vpack.c.bf16 %v70_v33, %v69_v30 }
  0x1c   :  { %636 = vmatprep.subr.bf16.mxu0 %v869_v14  ;;  %v77_v32 = vld [vmem:[%s1020_s3 + $0x8] sm:$0xff]  ;;  %v900_v37 = vpack.c.bf16 %v79_v36, %v78_v35  ;;  %v80_v38 = vld [vmem:[%s1020_s3 + $0x20] sm:$0xff]  ;;  %v645_v40 = vpack.c.bf16 %v52_v28, %v51_v27  ;;  %v53_v42 = vld [vmem:[#allocation2 + $0x50] sm:$0xff] }
  0x1d   :  { %v892_v34 = vpack.c.bf16 %v77_v32, %v76_v31  ;;  %v81_v39 = vld [vmem:[%s1020_s3 + $0x28] sm:$0xff]  ;;  %v54_v43 = vld [vmem:[#allocation2 + $0x58] sm:$0xff]  ;;  %v71_v44 = vld [vmem:[#allocation2 + $0xe0] sm:$0xff] }
  0x1e   :  { %v72_v45 = vld [vmem:[#allocation2 + $0xe8] sm:$0xff]  ;;  %v913_v46 = vpack.c.bf16 %v81_v39, %v80_v38  ;;  %v82_v47 = vld [vmem:[%s1020_s3 + $0x30] sm:$0xff]  ;;  %v83_v48 = vld [vmem:[%s1020_s3 + $0x38] sm:$0xff]  ;;  %v649_v49 = vpack.c.bf16 %v54_v43, %v53_v42 }
  0x1f   :  { %638 = vmatpush3.bf16.msra.mxu0 %v872_v19  ;;  %660 = vmatprep.subr.bf16.mxu1 %v892_v34  ;;  %v651_v50 = vpack.c.bf16 %v72_v45, %v71_v44  ;;  %v55_v51 = vld [vmem:[#allocation2 + $0x60] sm:$0xff]  ;;  %v56_v52 = vld [vmem:[#allocation2 + $0x68] sm:$0xff]  ;;  %v73_v53 = vld [vmem:[#allocation2 + $0xf0] sm:$0xff]  ;;  %v923_v55 = vpack.c.bf16 %v83_v48, %v82_v47 }
  0x20   :  { %640 = vmatprep.subr.bf16.mxu0 %v875_v20  ;;  %662 = vmatpush3.bf16.msra.mxu1 %v892_v34  ;;  %v74_v54 = vld [vmem:[#allocation2 + $0xf8] sm:$0xff]  ;;  %v84_v56 = vld [vmem:[%s1020_s3 + $0x40] sm:$0xff]  ;;  %v85_v57 = vld [vmem:[%s1020_s3 + $0x48] sm:$0xff]  ;;  %v653_v58 = vpack.c.bf16 %v56_v52, %v55_v51 }
  0x21   :  { %664 = vmatprep.subr.bf16.mxu1 %v900_v37  ;;  %v655_v59 = vpack.c.bf16 %v74_v54, %v73_v53  ;;  %v57_v60 = vld [vmem:[#allocation2 + $0x70] sm:$0xff]  ;;  %v58_v61 = vld [vmem:[#allocation2 + $0x78] sm:$0xff]  ;;  %v933_v62 = vpack.c.bf16 %v85_v57, %v84_v56  ;;  %v35_v0 = vld [vmem:[%s1017_s0] sm:$0xff] }
  0x22   :  { %v657_v63 = vpack.c.bf16 %v58_v61, %v57_v60  ;;  %v40_v1 = vld [vmem:[%s1017_s0 + $0x28] sm:$0xff]  ;;  %v39_v2 = vld [vmem:[%s1017_s0 + $0x20] sm:$0xff]  ;;  %v37_v4 = vld [vmem:[%s1017_s0 + $0x10] sm:$0xff] }
  0x23   :  { %642 = vmatpush3.bf16.msra.mxu0 %v881_v26  ;;  %v42_v5 = vld [vmem:[%s1017_s0 + $0x38] sm:$0xff]  ;;  %v41_v6 = vld [vmem:[%s1017_s0 + $0x30] sm:$0xff]  ;;  %v88_v10 = vld [vmem:[%s1020_s3 + $0x60] sm:$0xff] }
  0x24   :  { %644 = vmatprep.subr.bf16.mxu0 %v884_v29  ;;  %666 = vmatpush3.bf16.msra.mxu1 %v900_v37  ;;  %v89_v11 = vld [vmem:[%s1020_s3 + $0x68] sm:$0xff]  ;;  %v443_v18 = vld [vmem:[%s1019_s2] ss:$0 sm:$0xff] }
  0x25   :  { %668 = vmatprep.subr.bf16.mxu1 %v913_v46  ;;  %v683_v12 = vpack.c.bf16 %v89_v11, %v88_v10 }
  0x27   :  { %646 = vmatpush3.bf16.msra.mxu0 %v645_v40 }
  0x28   :  { %648 = vmatprep.subr.bf16.mxu0 %v647_v41  ;;  %670 = vmatpush3.bf16.msra.mxu1 %v913_v46 }
  0x29   :  { %672 = vmatprep.subr.bf16.mxu1 %v923_v55 }
  0x2b   :  { %650 = vmatpush3.bf16.msra.mxu0 %v649_v49 }
  0x2c   :  { %652 = vmatprep.subr.bf16.mxu0 %v651_v50  ;;  %674 = vmatpush3.bf16.msra.mxu1 %v923_v55 }
  0x2d   :  { %676 = vmatprep.subr.bf16.mxu1 %v933_v62 }
  0x2f   :  { %654 = vmatpush3.bf16.msra.mxu0 %v653_v58 }
  0x30   :  { %656 = vmatprep.subr.bf16.mxu0 %v655_v59  ;;  %678 = vmatpush3.bf16.msra.mxu1 %v933_v62 }
  0x33   :  { %658 = vmatpush3.bf16.msra.mxu0 %v657_v63 }
  0x34   :  { %692 = vmatprep.subr.bf16.mxu0 %v858_v3  ;;  %v38_v3 = vld [vmem:[%s1017_s0 + $0x18] sm:$0xff] }
  0x36   :  { %164 = vmatmul.mubr.f32.vlgmr.msra.gmra.mrb[0].mxu0 %v35_v0 }
  0x37   :  { %694 = vmatpush3.bf16.msra.mxu0 %v860_v7  ;;  %168 = vmatprep.mubr.f32.mxu0 %v40_v1  ;;  %v86_v7 = vld [vmem:[%s1020_s3 + $0x50] sm:$0xff] }
  0x38   :  { %696 = vmatprep.subr.bf16.mxu0 %v862_v8  ;;  %v87_v8 = vld [vmem:[%s1020_s3 + $0x58] sm:$0xff] }
  0x39   :  { %v679_v9 = vpack.c.bf16 %v87_v8, %v86_v7 }
  0x3a   :  { %169 = vmatmul.mubr.f32.gmra.mrb[2].mxu0 %v39_v2 }
  0x3b   :  { %698 = vmatpush3.bf16.msra.mxu0 %v866_v13  ;;  %323 = vmatprep.mubr.f32.mxu0 %v38_v3  ;;  %v90_v13 = vld [vmem:[%s1020_s3 + $0x70] sm:$0xff] }
  0x3c   :  { %700 = vmatprep.subr.bf16.mxu0 %v869_v14  ;;  %680 = vmatprep.subr.bf16.mxu1 %v679_v9  ;;  %v91_v14 = vld [vmem:[%s1020_s3 + $0x78] sm:$0xff] }
  0x3d   :  { %682 = vmatpush3.bf16.msra.mxu1 %v679_v9  ;;  %v687_v15 = vpack.c.bf16 %v91_v14, %v90_v13 }
  0x3e   :  { %684 = vmatprep.subr.bf16.mxu1 %v683_v12 }
  0x3f   :  { %702 = vmatpush3.bf16.msra.mxu0 %v872_v19 }
  0x40   :  { %704 = vmatprep.subr.bf16.mxu0 %v875_v20 }
  0x41   :  { %686 = vmatpush3.bf16.msra.mxu1 %v683_v12 }
  0x42   :  { %688 = vmatprep.subr.bf16.mxu1 %v687_v15 }
  0x43   :  { %706 = vmatpush3.bf16.msra.mxu0 %v881_v26 }
  0x44   :  { %708 = vmatprep.subr.bf16.mxu0 %v884_v29 }
  0x45   :  { %690 = vmatpush3.bf16.msra.mxu1 %v687_v15 }
  0x46   :  { %724 = vmatprep.subr.bf16.mxu1 %v892_v34 }
  0x47   :  { %710 = vmatpush3.bf16.msra.mxu0 %v645_v40 }
  0x48   :  { %712 = vmatprep.subr.bf16.mxu0 %v647_v41 }
  0x4b   :  { %714 = vmatpush3.bf16.msra.mxu0 %v649_v49 }
  0x4c   :  { %716 = vmatprep.subr.bf16.mxu0 %v651_v50 }
  0x4f   :  { %718 = vmatpush3.bf16.msra.mxu0 %v653_v58 }
  0x50   :  { %720 = vmatprep.subr.bf16.mxu0 %v655_v59 }
  0x53   :  { %722 = vmatpush3.bf16.msra.mxu0 %v657_v63 }
  0x56   :  { %324 = vmatmul.mubr.f32.vlgmr.msra.gmra.mrb[4].mxu0 %v37_v4 }
  0x57   :  { %328 = vmatprep.mubr.f32.mxu0 %v42_v5 }
  0x5a   :  { %329 = vmatmul.mubr.f32.gmra.mrb[6].mxu0 %v41_v6 }
 0x109   :  { %v477_v16 = vpop.f32.mrb[0].mxu0 }
 0x10a   :  { %v478_v17 = vpop.f32.mrb[1].mxu0 }
 0x10b   :  { %v479_v19 = vadd.f32 %v478_v17, %v477_v16 }
 0x10d   :  { %v480_v20 = vpop.f32.mrb[2].mxu0  ;;  %v166_v21 = vadd.f32 %v479_v19, %v443_v18 }
 0x10e   :  { %v481_v22 = vpop.f32.mrb[3].mxu0 }
 0x10f   :  { %v482_v23 = vadd.f32 %v481_v22, %v480_v20  ;;  %v174_v24 = vmax.f32 %v166_v21, 0.0 }
 0x111   :  { %v171_v25 = vadd.f32 %v482_v23, %v443_v18  ;;  %589 = vmatprep.mubr.f32.mxu1 %v174_v24 }
 0x113   :  { %v175_v26 = vmax.f32 %v171_v25, 0.0 }
 0x115   :  { %590 = vmatmul.mubr.f32.vlgmr.msra.gmra.mrb[0].mxu1 %v175_v26 }
 0x116   :  { %726 = vmatpush3.bf16.msra.mxu1 %v892_v34 }
 0x117   :  { %728 = vmatprep.subr.bf16.mxu1 %v900_v37 }
 0x11a   :  { %730 = vmatpush3.bf16.msra.mxu1 %v900_v37  ;;  %v444_v37 = vld [vmem:[%s1021_s4] ss:$0 sm:$0xff]  ;;  %s782_s4 = scalar_lea.vmem %s432_s9, 256 }
 0x11b   :  { %732 = vmatprep.subr.bf16.mxu1 %v913_v46  ;;  %p783_p8 = scmp.ne.s32.totalorder %s432_s9, %s782_s4  ;;  %p788_p10 = scmp.lt.s32.totalorder %s782_s4, %s782_s4 }
 0x11d   :  { %p789_p11 = por %p788_p10, %p787_p9 }
 0x11e   :  { %734 = vmatpush3.bf16.msra.mxu1 %v913_v46 }
 0x11f   :  { %736 = vmatprep.subr.bf16.mxu1 %v923_v55  ;;  %p790_p12 = pnand %p789_p11, %p783_p8 }
 0x122   :  { %738 = vmatpush3.bf16.msra.mxu1 %v923_v55 }
 0x123   :  { %740 = vmatprep.subr.bf16.mxu1 %v933_v62 }
 0x126   :  { %742 = vmatpush3.bf16.msra.mxu1 %v933_v62 }
 0x127   :  { %744 = vmatprep.subr.bf16.mxu1 %v679_v9 }
 0x129   :  { %v533_v27 = vpop.f32.mrb[4].mxu0 }
 0x12a   :  { %v534_v28 = vpop.f32.mrb[5].mxu0  ;;  %746 = vmatpush3.bf16.msra.mxu1 %v679_v9 }
 0x12b   :  { %v535_v29 = vadd.f32 %v534_v28, %v533_v27  ;;  %748 = vmatprep.subr.bf16.mxu1 %v683_v12 }
 0x12d   :  { %v326_v30 = vadd.f32 %v535_v29, %v443_v18  ;;  %v536_v31 = vpop.f32.mrb[6].mxu0 }
 0x12e   :  { %v537_v32 = vpop.f32.mrb[7].mxu0  ;;  %750 = vmatpush3.bf16.msra.mxu1 %v683_v12 }
 0x12f   :  { %v334_v33 = vmax.f32 %v326_v30, 0.0  ;;  %v538_v34 = vadd.f32 %v537_v32, %v536_v31  ;;  %752 = vmatprep.subr.bf16.mxu1 %v687_v15 }
 0x131   :  { %v331_v35 = vadd.f32 %v538_v34, %v443_v18  ;;  %624 = vmatprep.mubr.f32.mxu1 %v334_v33 }
 0x132   :  { %754 = vmatpush3.bf16.msra.mxu1 %v687_v15 }
 0x133   :  { %v335_v36 = vmax.f32 %v331_v35, 0.0 }
 0x135   :  { %625 = vmatmul.mubr.f32.vlgmr.msra.gmra.mrb[2].mxu1 %v335_v36 }
 0x1e8   :  { %v591_v38 = vpop.f32.mrb[0].mxu1 }
 0x1e9   :  { %v254_v39 = vadd.f32 %v591_v38, %v444_v37  ;;  %v248_v40 = vpop.f32.mrb[1].mxu1 }
 0x1ea   :  { %v249_v41 = vadd.f32 %v444_v37, %v248_v40 }
 0x1eb   :  { %v258_v51 = vmax.f32 %v254_v39, 0.0 }
 0x1ec   :  { %v257_v48 = vmax.f32 %v249_v41, 0.0 }
 0x208   :  { %v626_v42 = vpop.f32.mrb[2].mxu1 }
 0x209   :  { %v402_v43 = vpop.f32.mrb[3].mxu1  ;;  %v408_v45 = vadd.f32 %v626_v42, %v444_v37 }
 0x20a   :  { %v403_v44 = vadd.f32 %v444_v37, %v402_v43 }
 0x20b   :  { %v412_v47 = vmax.f32 %v408_v45, 0.0 }
 0x20c   :  { %v411_v46 = vmax.f32 %v403_v44, 0.0 }
 0x20e   :  { %415 = vrot.lane.b32.xlu0 %v411_v46, %s811_s7 }
 0x212   :  { %417 = vrot.lane.b32.xlu0 %v412_v47, %s811_s7 }
 0x280   :  { %v416_v49 = vpop.permute.xlu0 %415 }
 0x281   :  { %v422_v50 = vsel %vm421_vm0, %v257_v48, %v416_v49 }
 0x282   :  { %424 = vst [vmem:[#allocation5] sm:$0xff] %v422_v50 }
 0x284   :  { %v418_v52 = vpop.permute.xlu0 %417 }
 0x285   :  { %v423_v53 = vsel %vm421_vm0, %v258_v51, %v418_v52 }
 0x286   :  { %425 = vst [vmem:[#allocation5 + $0x8] sm:$0xff] %v423_v53 }
 0x287   :  { %793 = shalt.err (!%p790_p12)
}
 0x288   :  { %s794_s12 = scalar_lea.hbm %s1022_s5, 256 }
 0x289   :  { %p795_p13 = scmp.ne.s32.totalorder %s1022_s5, %s794_s12  ;;  %p798_p0 = scmp.lt.u32.totalorder %s794_s12, %s1022_s5 }
 0x28b   :  { %p800_p1 = pnand %p798_p0, %p795_p13 }
 0x28d   :  { %803 = shalt.err (!%p800_p1)
}
 0x28e   :  { %437 = dma.vmem_to_hbm [thread:$0]  %s432_s9, 256, %s1022_s5, [#allocation4], %s809_s28, %s809_s28, %s810_s29  }
 0x28f   :  { %806 = dma.done.wait [#allocation4], 256  }
 0x290   :  { %807 = vsyncadd [#allocation4], 4294967040 }
 0x291   :  { %441 = vsyncpa [#allocation3], 1 }
 0x292   :  { %442 = vsyncpa [#allocation4], 1 }

</bundles_post_ra>
